<compile_context>
chip_gen: v6e
topology: v6e:2x2x1
jax: 0.10.0
libtpu: 0.0.40
codegen_flags: <defaults>
</compile_context>

<pallas_src>
import jax
import jax.numpy as jnp
from jax.experimental import pallas as pl
from jax.experimental.pallas import tpu as pltpu


def _mlp_kernel(x_ref, w1_ref, b1_ref, w2_ref, b2_ref, out_ref):
    # x: (Bt, D_in), w1: (D_in, H), b1: (1, H), w2: (H, A), b2: (1, A)
    x = x_ref[...]
    h = jnp.dot(x, w1_ref[...], preferred_element_type=jnp.float32) + b1_ref[...]
    h = jnp.maximum(h, 0.0)                        # ReLU on VPU (f32)
    q = jnp.dot(h, w2_ref[...], preferred_element_type=jnp.float32) + b2_ref[...]
    out_ref[...] = q.astype(out_ref.dtype)


def _forward_small(state, w1, b1_2d, w2, b2_2d):
    """Single invocation, no grid: everything lives in VMEM for the call."""
    B = state.shape[0]
    A = w2.shape[1]
    vmem = pl.BlockSpec(memory_space=pltpu.MemorySpace.VMEM)
    return pl.pallas_call(
        _mlp_kernel,
        out_shape=jax.ShapeDtypeStruct((B, A), jnp.float32),
        in_specs=[vmem, vmem, vmem, vmem, vmem],
        out_specs=vmem,
    )(state, w1, b1_2d, w2, b2_2d)


def _forward_batched(state, w1, b1_2d, w2, b2_2d, *, batch_tile):
    """Batch-tiled path: parallel batch grid axis, unpadded (B, A) output."""
    B, D = state.shape
    H = w1.shape[1]
    A = w2.shape[1]
    n_tiles = pl.cdiv(B, batch_tile)   # ragged tail handled by masked stores
    return pl.pallas_call(
        _mlp_kernel,
        out_shape=jax.ShapeDtypeStruct((B, A), jnp.float32),
        grid=(n_tiles,),
        in_specs=[
            pl.BlockSpec((batch_tile, D), lambda i: (i, 0)),   # state tile
            pl.BlockSpec((D, H), lambda i: (0, 0)),            # w1 (resident)
            pl.BlockSpec((1, H), lambda i: (0, 0)),            # b1
            pl.BlockSpec((H, A), lambda i: (0, 0)),            # w2
            pl.BlockSpec((1, A), lambda i: (0, 0)),            # b2
        ],
        out_specs=pl.BlockSpec((batch_tile, A), lambda i: (i, 0)),
        compiler_params=pltpu.CompilerParams(
            dimension_semantics=("parallel",)),                # v7x: both TCs
    )(state, w1, b1_2d, w2, b2_2d)


def network_forward(state, w1, b1, w2, b2, *, batch_tile=1024):
    """state: (B, input_size) f32 -> q_values: (B, nb_action) f32.

    w1: (input_size, 30), b1: (30,), w2: (30, nb_action), b2: (nb_action,)
    """
    B, _ = state.shape
    b1_2d = b1.reshape(1, -1)
    b2_2d = b2.reshape(1, -1)

    if B <= batch_tile:
        # Fixed-overhead regime: skip all grid machinery.
        return _forward_small(state, w1, b1_2d, w2, b2_2d)

    # Large batch: ensure at least 2 grid steps (v7x has 2 TensorCores) and
    # keep the tile a multiple of 8 (sublane constraint on the batch axis).
    half = -(-B // 2)                       # ceil(B / 2)
    half = ((half + 7) // 8) * 8            # round up to multiple of 8
    tile = max(8, min(batch_tile, half))
    tile = (tile // 8) * 8
    return _forward_batched(state, w1, b1_2d, w2, b2_2d, batch_tile=tile)


def init_params(key, input_size, nb_action, hidden=30):
    """Deterministic init mimicking nn.Linear's uniform(-1/sqrt(fan_in), ...)."""
    k1, k2, k3, k4 = jax.random.split(key, 4)
    lim1 = 1.0 / jnp.sqrt(jnp.float32(input_size))
    lim2 = 1.0 / jnp.sqrt(jnp.float32(hidden))
    # Stored as [in, out] (transposed vs PyTorch's [out, in]) for x @ W.
    w1 = jax.random.uniform(k1, (input_size, hidden), jnp.float32, -lim1, lim1)
    b1 = jax.random.uniform(k2, (hidden,), jnp.float32, -lim1, lim1)
    w2 = jax.random.uniform(k3, (hidden, nb_action), jnp.float32, -lim2, lim2)
    b2 = jax.random.uniform(k4, (nb_action,), jnp.float32, -lim2, lim2)
    return w1, b1, w2, b2


if __name__ == "__main__":
    input_size = 8      # e.g. state dimension
    nb_action = 4
    batch = 2

    key = jax.random.PRNGKey(0)
    kx, kp = jax.random.split(key)
    state = jax.random.normal(kx, (batch, input_size), jnp.float32)
    w1, b1, w2, b2 = init_params(kp, input_size, nb_action)

    def ref_fwd(x):
        return jnp.maximum(x @ w1 + b1, 0.0) @ w2 + b2

    # Small-batch path (module-consistent shapes).
    q_values = network_forward(state, w1, b1, w2, b2)
    jax.block_until_ready(q_values)
    assert q_values.shape == (batch, nb_action)
    assert jnp.allclose(q_values, ref_fwd(state), atol=1e-5, rtol=1e-5)

    # Batched path: exact multiple of the tile (2 parallel grid steps).
    big_state = jax.random.normal(jax.random.PRNGKey(1), (2048, input_size),
                                  jnp.float32)
    q_big = network_forward(big_state, w1, b1, w2, b2)
    jax.block_until_ready(q_big)
    assert q_big.shape == (2048, nb_action)
    assert jnp.allclose(q_big, ref_fwd(big_state), atol=1e-5, rtol=1e-5)

    # Batched path with a ragged tail (no wrapper-side jnp.pad; masked stores).
    ragged_state = jax.random.normal(jax.random.PRNGKey(2), (2500, input_size),
                                     jnp.float32)
    q_rag = network_forward(ragged_state, w1, b1, w2, b2)
    jax.block_until_ready(q_rag)
    assert q_rag.shape == (2500, nb_action)
    assert jnp.allclose(q_rag, ref_fwd(ragged_state), atol=1e-5, rtol=1e-5)

    print("KERNEL_OK")
</pallas_src>

<mosaic_0001>
module attributes {stable_mosaic.version = 11 : i64} {
  func.func @_mlp_kernel(%arg0: memref<2x8xf32, #tpu.memory_space<vmem>>, %arg1: memref<8x30xf32, #tpu.memory_space<vmem>>, %arg2: memref<1x30xf32, #tpu.memory_space<vmem>>, %arg3: memref<30x4xf32, #tpu.memory_space<vmem>>, %arg4: memref<1x4xf32, #tpu.memory_space<vmem>>, %arg5: memref<2x4xf32, #tpu.memory_space<vmem>>) attributes {dimension_semantics = [], scalar_prefetch = 0 : i64, scratch_operands = 0 : i64, tpu.core_type = #tpu.core_type<tc>} {
    %c0 = arith.constant 0 : index
    %c0_0 = arith.constant 0 : index
    %0 = vector.load %arg0[%c0, %c0_0] : memref<2x8xf32, #tpu.memory_space<vmem>>, vector<2x8xf32>
    %c0_1 = arith.constant 0 : index
    %c0_2 = arith.constant 0 : index
    %1 = vector.load %arg1[%c0_1, %c0_2] : memref<8x30xf32, #tpu.memory_space<vmem>>, vector<8x30xf32>
    %cst = arith.constant dense<0.000000e+00> : vector<2x30xf32>
    %2 = tpu.matmul %0, %1, %cst {dimension_numbers = #tpu.dot_dimension_numbers<[1], [0], [0], [1], [0, 0, 1, 1], [], []>} : vector<2x8xf32>, vector<8x30xf32>, vector<2x30xf32> -> vector<2x30xf32>
    %c0_3 = arith.constant 0 : index
    %c0_4 = arith.constant 0 : index
    %3 = vector.load %arg2[%c0_3, %c0_4] : memref<1x30xf32, #tpu.memory_space<vmem>>, vector<1x30xf32>
    %4 = vector.broadcast %3 : vector<1x30xf32> to vector<2x30xf32>
    %5 = arith.addf %2, %4 : vector<2x30xf32>
    %cst_5 = arith.constant 0.000000e+00 : f32
    %6 = vector.broadcast %cst_5 : f32 to vector<2x30xf32>
    %7 = arith.maximumf %5, %6 : vector<2x30xf32>
    %c0_6 = arith.constant 0 : index
    %c0_7 = arith.constant 0 : index
    %8 = vector.load %arg3[%c0_6, %c0_7] : memref<30x4xf32, #tpu.memory_space<vmem>>, vector<30x4xf32>
    %cst_8 = arith.constant dense<0.000000e+00> : vector<2x4xf32>
    %9 = tpu.matmul %7, %8, %cst_8 {dimension_numbers = #tpu.dot_dimension_numbers<[1], [0], [0], [1], [0, 0, 1, 1], [], []>} : vector<2x30xf32>, vector<30x4xf32>, vector<2x4xf32> -> vector<2x4xf32>
    %c0_9 = arith.constant 0 : index
    %c0_10 = arith.constant 0 : index
    %10 = vector.load %arg4[%c0_9, %c0_10] : memref<1x4xf32, #tpu.memory_space<vmem>>, vector<1x4xf32>
    %11 = vector.broadcast %10 : vector<1x4xf32> to vector<2x4xf32>
    %12 = arith.addf %9, %11 : vector<2x4xf32>
    %c0_11 = arith.constant 0 : index
    %c0_12 = arith.constant 0 : index
    %13 = vector.load %arg5[%c0_11, %c0_12] : memref<2x4xf32, #tpu.memory_space<vmem>>, vector<2x4xf32>
    tpu.vector_store %arg5[%c0_11, %c0_12], %12 {strides = array<i32>} : memref<2x4xf32, #tpu.memory_space<vmem>>, vector<2x4xf32>,
    return
  }
}

</mosaic_0001>

<bundles_post_ra>
// kernel: tpu_custom_call.1
= control target key start
LH: loop header
LB: loop body
LE: loop exit
PB: predicated region body
PF: predicated region fallthrough
CT: control target
= control target key end

     0   :  { %vm30_vm0 = vcmask 64512   ;;  %v263_v2 = vmov 0.0   ;;  %vm264_vm1 = vmmov 0   ;;  %vm120_vm2 = vcmask 1045504   ;;  %s323_s0 = inlined_call_operand.vmem [shape: f32[2,8], index: 0, kind: input, shape index: {}]   ;;  %s324_s1 = inlined_call_operand.vmem [shape: f32[8,30], index: 1, kind: input, shape index: {}]   ;;  %s325_s2 = inlined_call_operand.vmem [shape: f32[1,30], index: 2, kind: input, shape index: {}]   ;;  %s326_s3 = inlined_call_operand.vmem [shape: f32[30,4], index: 3, kind: input, shape index: {}]   ;;  %s327_s4 = inlined_call_operand.vmem [shape: f32[1,4], index: 4, kind: input, shape index: {}]   ;;  %s328_s5 = inlined_call_operand.hbm [shape: f32[2,4], index: 5, kind: output, shape index: {}]  }
   0x1   :  { %v22_v0 = vld [vmem:[%s324_s1] sm:$0xff]  ;;  %222 = vmatprep.subr.mxu0 %v263_v2  ;;  %224 = vmatprep.mubr.msk.f32.mxu0 %vm264_vm1, %v263_v2  ;;  %v108_v3 = vld [vmem:[%s326_s3 + $0x18] sm:$0x3f] }
   0x2   :  { %v21_v1 = vld [vmem:[%s323_s0] sm:$0x3]  ;;  %223 = vmatpush3.msra.mxu0 %v22_v0  ;;  %227 = vmatprep.subr.mxu1 %v263_v2 }
   0x3   :  { %10 = vsyncpa [#allocation3], 0  ;;  %225 = vmatmul.mubr.msk.f32.vlgmr.msra.gmra.mxu0 %vm30_vm0, %v21_v1  ;;  %228 = vmatpush3.msk.msra.mxu1 %vm120_vm2, %v108_v3  ;;  %v107_v4 = vld [vmem:[%s326_s3 + $0x10] sm:$0xff]  ;;  %v106_v5 = vld [vmem:[%s326_s3 + $0x8] sm:$0xff]  ;;  %vm116_vm3 = vcmask 244736   ;;  %s265_s7 = smov [#allocation2]  }
   0x4   :  { %229 = vmatprep.subr.mxu1 %v263_v2  ;;  %235 = vmatprep.mubr.msk.f32.mxu1 %vm264_vm1, %v263_v2  ;;  %v105_v6 = vld [vmem:[%s326_s3] sm:$0xff]  ;;  %s202_s8 = sshll.u32 %s265_s7, 4  ;;  %vm194_vm4 = vcmask 25600   ;;  %s203_s8 = int_to_ptr.vmem [resolvable:$true] %s202_s8 }
   0x5   :  { %230 = vmatpush3.msra.mxu1 %v107_v4  ;;  %v210_v7 = vld [vmem:[%s325_s2] ss:$0 sm:$0xff]  ;;  %s241_s3 = scalar_lea.vmem %s203_s8, 32  ;;  %p246_p1 = scmp.lt.s32.totalorder %s203_s8, %s203_s8 }
   0x6   :  { %231 = vmatprep.subr.mxu1 %v263_v2  ;;  %v212_v12 = vld [vmem:[%s327_s4] ss:$0 sm:$0xff]  ;;  %p242_p0 = scmp.ne.s32.totalorder %s203_s8, %s241_s3  ;;  %p247_p2 = scmp.lt.s32.totalorder %s241_s3, %s241_s3 }
   0x7   :  { %232 = vmatpush3.msra.mxu1 %v106_v5 }
   0x8   :  { %233 = vmatprep.subr.mxu1 %v263_v2  ;;  %p248_p3 = por %p247_p2, %p246_p1 }
   0x9   :  { %234 = vmatpush3.msra.mxu1 %v105_v6 }
   0xa   :  { %p249_p4 = pnand %p248_p3, %p242_p0 }
  0xc3   :  { %v100_v8 = vpop.f32.mrf.mxu0 }
  0xc4   :  { %v101_v9 = vadd.f32 %v210_v7, %v100_v8 }
  0xc5   :  { %v226_v10 = vpop.f32.mrf.mxu0 }
  0xc6   :  { %v104_v11 = vmax.f32 %v101_v9, 0.0 }
  0xc8   :  { %236 = vmatmul.mubr.msk.f32.vlgmr.msra.gmra.mxu1 %vm116_vm3, %v104_v11 }
 0x188   :  { %v190_v13 = vpop.f32.mrf.mxu1 }
 0x189   :  { %v191_v14 = vadd.f32 %v212_v12, %v190_v13 }
 0x18a   :  { %v237_v15 = vpop.f32.mrf.mxu1 }
 0x18b   :  { %195 = vst.msk [vmem:[#allocation2] sm:$0x3] %vm194_vm4, %v191_v14 }
 0x18c   :  { %252 = shalt.err (!%p249_p4)
}
 0x18d   :  { %205 = dma.vmem_to_hbm [thread:$0]  %s203_s8, 32, %s328_s5, [#allocation3]  }
 0x18e   :  { %261 = dma.done.wait [#allocation3], 32  }
 0x18f   :  { %262 = vsyncadd [#allocation3], 4294967264 }
 0x190   :  { %209 = vsyncpa [#allocation3], 1 }

</bundles_post_ra>
